<compile_context>
chip_gen: v7x
topology: tpu7x:2x2x1
jax: 0.10.0
libtpu: 0.0.40
codegen_flags: <defaults>
</compile_context>

<pallas_src>
import jax
import jax.numpy as jnp
from jax.experimental import pallas as pl
from jax.experimental.pallas import tpu as pltpu


def _ca_kernel(x_ref, w_mu_ref, w_lv_ref, b_mu_ref, b_lv_ref, eps_ref,
               c_ref, kl_ref):
    x = x_ref[...]

    # Two lane-dense MXU dots (bf16 operands, f32 accumulation). mu / logvar
    # are produced directly -- no intra-vreg column slice of a fused output.
    mu = jnp.dot(x, w_mu_ref[...], preferred_element_type=jnp.float32)
    mu = mu + b_mu_ref[...]                       # (tb, out_dim), f32
    logvar = jnp.dot(x, w_lv_ref[...], preferred_element_type=jnp.float32)
    logvar = logvar + b_lv_ref[...]               # (tb, out_dim), f32

    # Single EUP exp per element; exp(logvar) == std*std.
    std = jnp.exp(0.5 * logvar)

    # Per-tile KL partial sum. Finalized on the host as
    #   kl = -0.5 * sum(partials) / (B * out_dim)
    term = 1.0 + logvar - mu * mu - std * std + 1e-8
    kl_ref[0] = jnp.sum(term, keepdims=True)      # (1,1) into the (1,1,1) block

    # Reparameterization: c_hat = mu + eps * std
    c_ref[...] = (mu + eps_ref[...] * std).astype(c_ref.dtype)


def _pick_batch_tile(batch, max_tile=1024):
    """Largest multiple-of-8 divisor of `batch` that is <= max_tile."""
    if batch <= max_tile:
        return batch
    for tb in range(max_tile, 0, -8):
        if batch % tb == 0:
            return tb
    return batch  # fall back to a single (large) block


def conditioning_augmentation(x, w, b, eps, *, use_bf16_matmul=True):
    """x: (B, D_in), w: (D_in, 2*D_out), b: (1, 2*D_out) or (2*D_out,), eps: (B, D_out)."""
    B, d_in = x.shape
    out_dim = eps.shape[1]
    assert w.shape == (d_in, 2 * out_dim)
    b = jnp.reshape(b, (1, 2 * out_dim)).astype(jnp.float32)

    # Host-side split of the fc parameters (mu half / logvar half) so the
    # kernel never slices at the lane-64 boundary.
    w_mu, w_lv = w[:, :out_dim], w[:, out_dim:]
    b_mu, b_lv = b[:, :out_dim], b[:, out_dim:]

    if use_bf16_matmul:
        x_mm = x.astype(jnp.bfloat16)
        w_mu = w_mu.astype(jnp.bfloat16)
        w_lv = w_lv.astype(jnp.bfloat16)
    else:
        x_mm = x

    tb = _pick_batch_tile(B)
    assert B % tb == 0
    n_tiles = B // tb

    c_hat, kl_parts = pl.pallas_call(
        _ca_kernel,
        out_shape=(
            jax.ShapeDtypeStruct((B, out_dim), jnp.float32),
            jax.ShapeDtypeStruct((n_tiles, 1, 1), jnp.float32),
        ),
        grid_spec=pltpu.PrefetchScalarGridSpec(
            num_scalar_prefetch=0,
            grid=(n_tiles,),
            in_specs=[
                pl.BlockSpec((tb, d_in), lambda i: (i, 0)),       # x tile
                pl.BlockSpec((d_in, out_dim), lambda i: (0, 0)),  # w_mu (resident)
                pl.BlockSpec((d_in, out_dim), lambda i: (0, 0)),  # w_logvar (resident)
                pl.BlockSpec((1, out_dim), lambda i: (0, 0)),     # b_mu (resident)
                pl.BlockSpec((1, out_dim), lambda i: (0, 0)),     # b_logvar (resident)
                pl.BlockSpec((tb, out_dim), lambda i: (i, 0)),    # eps tile
            ],
            out_specs=(
                pl.BlockSpec((tb, out_dim), lambda i: (i, 0)),    # c_hat tile
                pl.BlockSpec((1, 1, 1), lambda i: (i, 0, 0)),     # per-tile KL partial
            ),
        ),
        # Every grid step writes disjoint output blocks -> safe to mark the
        # batch axis parallel (megacore sharding on v7x; no-op on v5e/v6e).
        compiler_params=pltpu.CompilerParams(
            dimension_semantics=("parallel",),
        ),
    )(x_mm, w_mu, w_lv, b_mu, b_lv, eps)

    kl = -0.5 * (jnp.sum(kl_parts) / jnp.float32(B * out_dim))
    return c_hat, kl


def conditioning_augmentation_ref(x, w, b, eps, *, use_bf16_matmul=False):
    """Pure-JAX reference mirroring the PyTorch module (optionally with the
    same bf16 matmul-operand cast the kernel uses)."""
    out_dim = eps.shape[1]
    b = jnp.reshape(b, (1, -1))
    if use_bf16_matmul:
        y = jnp.dot(x.astype(jnp.bfloat16), w.astype(jnp.bfloat16),
                    preferred_element_type=jnp.float32) + b
    else:
        y = x @ w + b
    mu = y[:, :out_dim]
    logvar = y[:, out_dim:]
    kl = -0.5 * jnp.mean(1.0 + logvar - mu ** 2 - jnp.exp(logvar) + 1e-8)
    std = jnp.exp(0.5 * logvar)
    c_hat = mu + eps * std
    return c_hat, kl


if __name__ == "__main__":
    # Small shapes consistent with the module's forward: (B, input_dim) -> (B, output_dim)
    B, input_dim, output_dim = 8, 32, 64

    key = jax.random.PRNGKey(0)
    k_x, k_w, k_b, k_eps = jax.random.split(key, 4)

    x = jax.random.normal(k_x, (B, input_dim), dtype=jnp.float32)
    # Deterministic parameter init (nn.Linear-like uniform bound 1/sqrt(fan_in)).
    bound = 1.0 / jnp.sqrt(jnp.float32(input_dim))
    w = jax.random.uniform(
        k_w, (input_dim, 2 * output_dim), minval=-bound, maxval=bound, dtype=jnp.float32
    )
    b = jax.random.uniform(
        k_b, (1, 2 * output_dim), minval=-bound, maxval=bound, dtype=jnp.float32
    )
    # Reparameterization noise (torch.randn_like equivalent), generated host-side
    # so the kernel is deterministic and verifiable.
    eps = jax.random.normal(k_eps, (B, output_dim), dtype=jnp.float32)

    c_hat, kl_loss = conditioning_augmentation(x, w, b, eps)
    jax.block_until_ready((c_hat, kl_loss))

    # Matched-precision reference (same bf16 matmul operands) -> tight check.
    c_m, kl_m = conditioning_augmentation_ref(x, w, b, eps, use_bf16_matmul=True)
    assert jnp.allclose(c_hat, c_m, atol=1e-4, rtol=1e-4)
    assert jnp.allclose(kl_loss, kl_m, atol=1e-4, rtol=1e-4)

    # Full-f32 reference mirroring the PyTorch module -> loose check (the only
    # difference is the bf16 rounding of the matmul operands).
    c_f, kl_f = conditioning_augmentation_ref(x, w, b, eps, use_bf16_matmul=False)
    assert jnp.allclose(c_hat, c_f, atol=5e-2, rtol=5e-2)
    assert jnp.allclose(kl_loss, kl_f, atol=5e-2, rtol=5e-2)

    print("KERNEL_OK")
</pallas_src>

<mosaic_0001>
module attributes {stable_mosaic.version = 11 : i64} {
  func.func @_ca_kernel(%arg0: i32, %arg1: memref<8x32xbf16, #tpu.memory_space<vmem>>, %arg2: memref<32x64xbf16, #tpu.memory_space<vmem>>, %arg3: memref<32x64xbf16, #tpu.memory_space<vmem>>, %arg4: memref<1x64xf32, #tpu.memory_space<vmem>>, %arg5: memref<1x64xf32, #tpu.memory_space<vmem>>, %arg6: memref<8x64xf32, #tpu.memory_space<vmem>>, %arg7: memref<8x64xf32, #tpu.memory_space<vmem>>, %arg8: memref<1x1x1xf32, #tpu.memory_space<vmem>>) attributes {dimension_semantics = [#tpu.dimension_semantics<parallel>], iteration_bounds = array<i64: 1>, scalar_prefetch = 0 : i64, scratch_operands = 0 : i64, tpu.core_type = #tpu.core_type<tc>, window_params = [{transform_indices = @transform_0, window_bounds = array<i64: 8, 32>}, {pipeline_mode = #tpu.pipeline_mode<synchronous>, transform_indices = @transform_1, window_bounds = array<i64: 32, 64>}, {pipeline_mode = #tpu.pipeline_mode<synchronous>, transform_indices = @transform_2, window_bounds = array<i64: 32, 64>}, {pipeline_mode = #tpu.pipeline_mode<synchronous>, transform_indices = @transform_3, window_bounds = array<i64: 1, 64>}, {pipeline_mode = #tpu.pipeline_mode<synchronous>, transform_indices = @transform_4, window_bounds = array<i64: 1, 64>}, {transform_indices = @transform_5, window_bounds = array<i64: 8, 64>}, {transform_indices = @transform_6, window_bounds = array<i64: 8, 64>}, {transform_indices = @transform_7, window_bounds = array<i64: 1, 1, 1>}]} {
    %c0 = arith.constant 0 : index
    %c0_0 = arith.constant 0 : index
    %0 = vector.load %arg1[%c0, %c0_0] : memref<8x32xbf16, #tpu.memory_space<vmem>>, vector<8x32xbf16>
    %c0_1 = arith.constant 0 : index
    %c0_2 = arith.constant 0 : index
    %1 = vector.load %arg2[%c0_1, %c0_2] : memref<32x64xbf16, #tpu.memory_space<vmem>>, vector<32x64xbf16>
    %cst = arith.constant dense<0.000000e+00> : vector<8x64xf32>
    %2 = tpu.matmul %0, %1, %cst {dimension_numbers = #tpu.dot_dimension_numbers<[1], [0], [0], [1], [0, 0, 1, 1], [], []>} : vector<8x32xbf16>, vector<32x64xbf16>, vector<8x64xf32> -> vector<8x64xf32>
    %c0_3 = arith.constant 0 : index
    %c0_4 = arith.constant 0 : index
    %3 = vector.load %arg4[%c0_3, %c0_4] : memref<1x64xf32, #tpu.memory_space<vmem>>, vector<1x64xf32>
    %4 = vector.broadcast %3 : vector<1x64xf32> to vector<8x64xf32>
    %5 = arith.addf %2, %4 : vector<8x64xf32>
    %c0_5 = arith.constant 0 : index
    %c0_6 = arith.constant 0 : index
    %6 = vector.load %arg3[%c0_5, %c0_6] : memref<32x64xbf16, #tpu.memory_space<vmem>>, vector<32x64xbf16>
    %cst_7 = arith.constant dense<0.000000e+00> : vector<8x64xf32>
    %7 = tpu.matmul %0, %6, %cst_7 {dimension_numbers = #tpu.dot_dimension_numbers<[1], [0], [0], [1], [0, 0, 1, 1], [], []>} : vector<8x32xbf16>, vector<32x64xbf16>, vector<8x64xf32> -> vector<8x64xf32>
    %c0_8 = arith.constant 0 : index
    %c0_9 = arith.constant 0 : index
    %8 = vector.load %arg5[%c0_8, %c0_9] : memref<1x64xf32, #tpu.memory_space<vmem>>, vector<1x64xf32>
    %9 = vector.broadcast %8 : vector<1x64xf32> to vector<8x64xf32>
    %10 = arith.addf %7, %9 : vector<8x64xf32>
    %cst_10 = arith.constant 5.000000e-01 : f32
    %11 = vector.broadcast %cst_10 : f32 to vector<8x64xf32>
    %12 = arith.mulf %11, %10 : vector<8x64xf32>
    %13 = math.exp %12 : vector<8x64xf32>
    %cst_11 = arith.constant 1.000000e+00 : f32
    %14 = vector.broadcast %cst_11 : f32 to vector<8x64xf32>
    %15 = arith.addf %14, %10 : vector<8x64xf32>
    %16 = arith.mulf %5, %5 : vector<8x64xf32>
    %17 = arith.subf %15, %16 : vector<8x64xf32>
    %18 = arith.mulf %13, %13 : vector<8x64xf32>
    %19 = arith.subf %17, %18 : vector<8x64xf32>
    %cst_12 = arith.constant 9.99999993E-9 : f32
    %20 = vector.broadcast %cst_12 : f32 to vector<8x64xf32>
    %21 = arith.addf %19, %20 : vector<8x64xf32>
    %22 = vector.shape_cast %21 : vector<8x64xf32> to vector<1x8x64xf32>
    %cst_13 = arith.constant dense<0.000000e+00> : vector<1xf32>
    %23 = vector.multi_reduction <add>, %22, %cst_13 [1, 2] : vector<1x8x64xf32> to vector<1xf32>
    %24 = vector.shape_cast %23 : vector<1xf32> to vector<1x1x1xf32>
    %25 = vector.extract %24[0, 0, 0] : f32 from vector<1x1x1xf32>
    %26 = vector.broadcast %25 : f32 to vector<1x1xf32>
    %c0_14 = arith.constant 0 : index
    %c0_15 = arith.constant 0 : index
    %c0_16 = arith.constant 0 : index
    %27 = vector.load %arg8[%c0_14, %c0_15, %c0_16] : memref<1x1x1xf32, #tpu.memory_space<vmem>>, vector<1x1x1xf32>
    %28 = vector.shape_cast %27 : vector<1x1x1xf32> to vector<1x1xf32>
    %29 = vector.shape_cast %26 : vector<1x1xf32> to vector<1x1x1xf32>
    tpu.vector_store %arg8[%c0_14, %c0_15, %c0_16], %29 {strides = array<i32>} : memref<1x1x1xf32, #tpu.memory_space<vmem>>, vector<1x1x1xf32>,
    %c0_17 = arith.constant 0 : index
    %c0_18 = arith.constant 0 : index
    %30 = vector.load %arg6[%c0_17, %c0_18] : memref<8x64xf32, #tpu.memory_space<vmem>>, vector<8x64xf32>
    %31 = arith.mulf %30, %13 : vector<8x64xf32>
    %32 = arith.addf %5, %31 : vector<8x64xf32>
    %c0_19 = arith.constant 0 : index
    %c0_20 = arith.constant 0 : index
    %33 = vector.load %arg7[%c0_19, %c0_20] : memref<8x64xf32, #tpu.memory_space<vmem>>, vector<8x64xf32>
    tpu.vector_store %arg7[%c0_19, %c0_20], %32 {strides = array<i32>} : memref<8x64xf32, #tpu.memory_space<vmem>>, vector<8x64xf32>,
    return
  }
  func.func @transform_0(%arg0: i32) -> (i32, i32) {
    %c0_i32 = arith.constant 0 : i32
    %c0_i32_0 = arith.constant 0 : i32
    return %arg0, %c0_i32 : i32, i32
  }
  func.func @transform_1(%arg0: i32) -> (i32, i32) {
    %c0_i32 = arith.constant 0 : i32
    %c0_i32_0 = arith.constant 0 : i32
    %c0_i32_1 = arith.constant 0 : i32
    return %c0_i32, %c0_i32_0 : i32, i32
  }
  func.func @transform_2(%arg0: i32) -> (i32, i32) {
    %c0_i32 = arith.constant 0 : i32
    %c0_i32_0 = arith.constant 0 : i32
    %c0_i32_1 = arith.constant 0 : i32
    return %c0_i32, %c0_i32_0 : i32, i32
  }
  func.func @transform_3(%arg0: i32) -> (i32, i32) {
    %c0_i32 = arith.constant 0 : i32
    %c0_i32_0 = arith.constant 0 : i32
    %c0_i32_1 = arith.constant 0 : i32
    return %c0_i32, %c0_i32_0 : i32, i32
  }
  func.func @transform_4(%arg0: i32) -> (i32, i32) {
    %c0_i32 = arith.constant 0 : i32
    %c0_i32_0 = arith.constant 0 : i32
    %c0_i32_1 = arith.constant 0 : i32
    return %c0_i32, %c0_i32_0 : i32, i32
  }
  func.func @transform_5(%arg0: i32) -> (i32, i32) {
    %c0_i32 = arith.constant 0 : i32
    %c0_i32_0 = arith.constant 0 : i32
    return %arg0, %c0_i32 : i32, i32
  }
  func.func @transform_6(%arg0: i32) -> (i32, i32) {
    %c0_i32 = arith.constant 0 : i32
    %c0_i32_0 = arith.constant 0 : i32
    return %arg0, %c0_i32 : i32, i32
  }
  func.func @transform_7(%arg0: i32) -> (i32, i32, i32) {
    %c0_i32 = arith.constant 0 : i32
    %c0_i32_0 = arith.constant 0 : i32
    %c0_i32_1 = arith.constant 0 : i32
    return %arg0, %c0_i32, %c0_i32_0 : i32, i32, i32
  }
}

</mosaic_0001>

<bundles_post_ra>
// kernel: tpu_custom_call.1
= control target key start
LH: loop header
LB: loop body
LE: loop exit
PB: predicated region body
PF: predicated region fallthrough
CT: control target
= control target key end

     0   :  { %13 = vsyncpa [#allocation3], 0  ;;  %s544_s0 = inlined_call_operand.hbm [shape: bf16[8,32], index: 0, kind: input, shape index: {}]   ;;  %s545_s1 = inlined_call_operand.hbm [shape: bf16[32,64], index: 1, kind: input, shape index: {}]   ;;  %s546_s2 = inlined_call_operand.hbm [shape: bf16[32,64], index: 2, kind: input, shape index: {}]   ;;  %s547_s3 = inlined_call_operand.vmem [shape: f32[1,64], index: 3, kind: input, shape index: {}]   ;;  %s548_s4 = inlined_call_operand.vmem [shape: f32[1,64], index: 4, kind: input, shape index: {}]   ;;  %s549_s5 = inlined_call_operand.vmem [shape: f32[8,64], index: 5, kind: input, shape index: {}]   ;;  %s550_s6 = inlined_call_operand.hbm [shape: f32[8,64], index: 6, kind: output, shape index: {0}]   ;;  %s551_s7 = inlined_call_operand.hbm [shape: f32[1,1,1], index: 7, kind: output, shape index: {1}]  }
   0x1   :  { %14 = vsyncpa [#allocation6], 0 }
   0x2   :  { %15 = vsyncpa [#allocation4], 0 }
   0x3   :  { %16 = vsyncpa [#allocation10], 0  ;;  %s420_s24 = smov [#allocation5]   ;;  %s302_s28 = scalar_lea.hbm %s545_s1, 256 }
   0x4   :  { %s32_s25 = sshll.u32 %s420_s24, 4  ;;  %p303_p0 = scmp.ne.s32.totalorder %s545_s1, %s302_s28  ;;  %s33_s25 = int_to_ptr.vmem [resolvable:$true] %s32_s25 }
   0x5   :  { %p306_p1 = scmp.lt.u32.totalorder %s302_s28, %s545_s1 }
   0x7   :  { %p308_p2 = pnand %p306_p1, %p303_p0 }
   0x9   :  { %311 = shalt.err (!%p308_p2)
}
   0xa   :  { %s312_s10 = scalar_lea.vmem %s33_s25, 256  ;;  %p317_p4 = scmp.lt.s32.totalorder %s33_s25, %s33_s25 }
   0xb   :  { %p313_p3 = scmp.ne.s32.totalorder %s33_s25, %s312_s10  ;;  %p318_p5 = scmp.lt.s32.totalorder %s312_s10, %s312_s10 }
   0xd   :  { %p319_p6 = por %p318_p5, %p317_p4 }
   0xf   :  { %p320_p7 = pnand %p319_p6, %p313_p3 }
  0x11   :  { %323 = shalt.err (!%p320_p7)
}
  0x12   :  { %s421_s11 = smov 64   ;;  %s422_s12 = smov 4  }
  0x13   :  { %38 = dma.hbm_to_vmem [thread:$0]  %s545_s1, 256, %s33_s25, [#allocation6], %s421_s11, %s421_s11, %s422_s12  }
  0x14   :  { %s423_s15 = smov [#allocation2]   ;;  %s424_s17 = smov [#allocation7]  }
  0x15   :  { %s23_s16 = sshll.u32 %s423_s15, 4  ;;  %s44_s18 = sshll.u32 %s424_s17, 4  ;;  %s24_s16 = int_to_ptr.vmem [resolvable:$true] %s23_s16  ;;  %s45_s18 = int_to_ptr.vmem [resolvable:$true] %s44_s18 }
  0x16   :  { %s324_s21 = scalar_lea.hbm %s544_s0, 64 }
  0x17   :  { %p325_p8 = scmp.ne.s32.totalorder %s544_s0, %s324_s21  ;;  %p328_p9 = scmp.lt.u32.totalorder %s324_s21, %s544_s0 }
  0x19   :  { %p330_p10 = pnand %p328_p9, %p325_p8 }
  0x1b   :  { %333 = shalt.err (!%p330_p10)
}
  0x1c   :  { %s334_s1 = scalar_lea.vmem %s24_s16, 64  ;;  %p339_p12 = scmp.lt.s32.totalorder %s24_s16, %s24_s16 }
  0x1d   :  { %p335_p11 = scmp.ne.s32.totalorder %s24_s16, %s334_s1  ;;  %p340_p13 = scmp.lt.s32.totalorder %s334_s1, %s334_s1 }
  0x1f   :  { %p341_p0 = por %p340_p13, %p339_p12 }
  0x21   :  { %p342_p1 = pnand %p341_p0, %p335_p11 }
  0x23   :  { %345 = shalt.err (!%p342_p1)
}
  0x24   :  { %26 = dma.hbm_to_vmem [thread:$0]  %s544_s0, 64, %s24_s16, [#allocation3]  }
  0x25   :  { %s346_s30 = scalar_lea.hbm %s546_s2, 256 }
  0x26   :  { %p347_p2 = scmp.ne.s32.totalorder %s546_s2, %s346_s30  ;;  %p350_p3 = scmp.lt.u32.totalorder %s346_s30, %s546_s2 }
  0x28   :  { %p352_p4 = pnand %p350_p3, %p347_p2 }
  0x2a   :  { %355 = shalt.err (!%p352_p4)
}
  0x2b   :  { %s356_s14 = scalar_lea.vmem %s45_s18, 256  ;;  %p361_p6 = scmp.lt.s32.totalorder %s45_s18, %s45_s18 }
  0x2c   :  { %p357_p5 = scmp.ne.s32.totalorder %s45_s18, %s356_s14  ;;  %p362_p7 = scmp.lt.s32.totalorder %s356_s14, %s356_s14 }
  0x2e   :  { %p363_p8 = por %p362_p7, %p361_p6 }
  0x30   :  { %p364_p9 = pnand %p363_p8, %p357_p5 }
  0x32   :  { %367 = shalt.err (!%p364_p9)
}
  0x33   :  { %50 = dma.hbm_to_vmem [thread:$0]  %s546_s2, 256, %s45_s18, [#allocation6], %s421_s11, %s421_s11, %s422_s12  }
  0x34   :  { %412 = dma.done.wait [#allocation3], 64  }
  0x35   :  { %413 = vsyncadd [#allocation3], 4294967232 }
  0x36   :  { %414 = dma.done.wait [#allocation6], 512  }
  0x37   :  { %415 = vsyncadd [#allocation6], 4294966784  ;;  %v425_v0 = vmov 0.0   ;;  %vm426_vm0 = vmmov 0   ;;  %v296_v1 = vld [vmem:[#allocation5] sm:$0xff]   ;;  %v297_v2 = vld [vmem:[#allocation7] sm:$0xff]  }
  0x38   :  { %269 = vmatprep.subr.bf16.mxu0 %v425_v0  ;;  %277 = vmatprep.subr.bf16.mxu1 %v425_v0  ;;  %v298_v3 = vld [vmem:[#allocation5 + $0x8] sm:$0xff]   ;;  %v299_v4 = vld [vmem:[#allocation7 + $0x8] sm:$0xff]   ;;  %vm91_vm1 = vcmask 261120   ;;  %v255_v6 = vld [vmem:[%s547_s3] ss:$0 sm:$0xff]  ;;  %vm207_vm2 = vcmask 523264  }
  0x39   :  { %273 = vmatprep.mubr.msk.bf16.mxu0 %vm426_vm0, %v425_v0  ;;  %281 = vmatprep.mubr.msk.bf16.mxu1 %vm426_vm0, %v425_v0  ;;  %v67_v5 = vld [vmem:[#allocation2] sm:$0xf]  ;;  %v259_v7 = vld [vmem:[%s548_s4] ss:$0 sm:$0xff]  ;;  %s427_s4 = smov [#allocation8]  }
  0x3a   :  { %270 = vmatpush3.bf16.msra.mxu0 %v296_v1  ;;  %278 = vmatpush3.bf16.msra.mxu1 %v297_v2  ;;  %v221_v23 = vld [vmem:[%s549_s5] sm:$0xff]  ;;  %s231_s18 = sshll.u32 %s427_s4, 4  ;;  %s232_s18 = int_to_ptr.vmem [resolvable:$true] %s231_s18 }
  0x3b   :  { %271 = vmatprep.subr.bf16.mxu0 %v425_v0  ;;  %279 = vmatprep.subr.bf16.mxu1 %v425_v0  ;;  %s368_s19 = scalar_lea.vmem %s232_s18, 128  ;;  %p373_p11 = scmp.lt.s32.totalorder %s232_s18, %s232_s18 }
  0x3c   :  { %p369_p10 = scmp.ne.s32.totalorder %s232_s18, %s368_s19  ;;  %p374_p12 = scmp.lt.s32.totalorder %s368_s19, %s368_s19 }
  0x3e   :  { %272 = vmatpush3.bf16.msra.mxu0 %v298_v3  ;;  %280 = vmatpush3.bf16.msra.mxu1 %v299_v4  ;;  %p375_p13 = por %p374_p12, %p373_p11 }
  0x40   :  { %p376_p0 = pnand %p375_p13, %p369_p10 }
  0x41   :  { %274 = vmatmul.mubr.msk.bf16.vlgmr.msra.gmra.mrb[0].mxu0 %vm91_vm1, %v67_v5  ;;  %282 = vmatmul.mubr.msk.bf16.vlgmr.msra.gmra.mrb[0].mxu1 %vm91_vm1, %v67_v5 }
 0x114   :  { %v129_v8 = vpop.f32.mrb[0].mxu0  ;;  %v192_v10 = vpop.f32.mrb[0].mxu1 }
 0x115   :  { %v130_v9 = vadd.f32 %v255_v6, %v129_v8  ;;  %v275_v11 = vpop.f32.mrb[1].mxu0  ;;  %v193_v12 = vadd.f32 %v259_v7, %v192_v10  ;;  %v283_v13 = vpop.f32.mrb[1].mxu1 }
 0x116   :  { %v132_v14 = vpop.f32.mrb[2].mxu0  ;;  %v195_v16 = vpop.f32.mrb[2].mxu1 }
 0x117   :  { %v202_v15 = vmul.f32 %v130_v9, %v130_v9  ;;  %v276_v17 = vpop.f32.mrb[3].mxu0  ;;  %v198_v18 = vmul.f32 0.5, %v193_v12  ;;  %v201_v19 = vadd.f32 1.0, %v193_v12  ;;  %v284_v20 = vpop.f32.mrb[3].mxu1 }
 0x119   :  { %v199_v21 = vmul.f32 1.442695, %v198_v18  ;;  %v203_v22 = vsub.f32 %v201_v19, %v202_v15 }
 0x11b   :  { %300 = vpow2.f32 %v199_v21 }
 0x125   :  { %v301_v24 = vpop.eup %300 }
 0x126   :  { %v204_v25 = vmul.f32 %v301_v24, %v301_v24  ;;  %v222_v26 = vmul.f32 %v301_v24, %v221_v23 }
 0x128   :  { %v205_v27 = vsub.f32 %v203_v22, %v204_v25  ;;  %v223_v28 = vadd.f32 %v222_v26, %v130_v9 }
 0x12a   :  { %v206_v29 = vadd.f32 1e-08, %v205_v27  ;;  %224 = vst.msk [vmem:[#allocation8] sm:$0xff] %vm207_vm2, %v223_v28 }
 0x12c   :  { %v208_v30 = vsel %vm207_vm2, %v206_v29, 0.0 }
 0x12d   :  { %209 = vadd.xlane.f32.xlu0 %v208_v30 }
 0x12e   :  { %379 = shalt.err (!%p376_p0)
}
 0x12f   :  { %s380_s21 = scalar_lea.hbm %s550_s6, 128 }
 0x130   :  { %p381_p1 = scmp.ne.s32.totalorder %s550_s6, %s380_s21  ;;  %p384_p2 = scmp.lt.u32.totalorder %s380_s21, %s550_s6 }
 0x132   :  { %p386_p3 = pnand %p384_p2, %p381_p1 }
 0x134   :  { %389 = shalt.err (!%p386_p3)
}
 0x135   :  { %234 = dma.vmem_to_hbm [thread:$0]  %s232_s18, 128, %s550_s6, [#allocation4]   ;;  %vm219_vm3 = vcmask 0  }
 0x136   :  { %s428_s27 = smov [#allocation9]  }
 0x137   :  { %s241_s28 = sshll.u32 %s428_s27, 4  ;;  %s242_s28 = int_to_ptr.vmem [resolvable:$true] %s241_s28 }
 0x138   :  { %s390_s30 = scalar_lea.vmem %s242_s28, 16  ;;  %s394_s8 = scalar_lea.vmem %s242_s28, 32 }
 0x139   :  { %p391_p4 = scmp.ne.s32.totalorder %s242_s28, %s390_s30  ;;  %p395_p5 = scmp.lt.s32.totalorder %s242_s28, %s242_s28 }
 0x13a   :  { %p396_p6 = scmp.lt.s32.totalorder %s394_s8, %s390_s30 }
 0x13c   :  { %p397_p7 = por %p396_p6, %p395_p5 }
 0x13e   :  { %p398_p8 = pnand %p397_p7, %p391_p4 }
 0x1ba   :  { %v210_v31 = vpop.xlane.xlu0 %209 }
 0x1bb   :  { %v211_v32 = vrot.slane %v210_v31, 4 }
 0x1bd   :  { %v212_v33 = vadd.f32 %v211_v32, %v210_v31 }
 0x1bf   :  { %v213_v34 = vrot.slane %v212_v33, 2 }
 0x1c1   :  { %v214_v35 = vadd.f32 %v213_v34, %v212_v33 }
 0x1c3   :  { %v215_v36 = vrot.slane %v214_v35, 1 }
 0x1c5   :  { %v216_v37 = vadd.f32 %v215_v36, %v214_v35 }
 0x1c7   :  { %285 = vpush %v216_v37 }
 0x1f8   :  { %s286_s29 = spop %285 }
 0x1f9   :  { %v218_v38 = vstv %s286_s29 }
 0x1fa   :  { %220 = vst.msk [vmem:[#allocation9] sm:$0x1] %vm219_vm3, %v218_v38 }
 0x1fb   :  { %401 = shalt.err (!%p398_p8)
}
 0x1fc   :  { %s402_s10 = scalar_lea.hbm %s551_s7, 16 }
 0x1fd   :  { %p403_p9 = scmp.ne.s32.totalorder %s551_s7, %s402_s10  ;;  %p406_p10 = scmp.lt.u32.totalorder %s402_s10, %s551_s7 }
 0x1ff   :  { %p408_p11 = pnand %p406_p10, %p403_p9 }
 0x201   :  { %411 = shalt.err (!%p408_p11)
}
 0x202   :  { %244 = dma.vmem_to_hbm [thread:$0]  %s242_s28, 16, %s551_s7, [#allocation10]  }
 0x203   :  { %416 = dma.done.wait [#allocation4], 128  }
 0x204   :  { %417 = vsyncadd [#allocation4], 4294967168 }
 0x205   :  { %418 = dma.done.wait [#allocation10], 16  }
 0x206   :  { %419 = vsyncadd [#allocation10], 4294967280 }
 0x207   :  { %251 = vsyncpa [#allocation3], 1 }
 0x208   :  { %252 = vsyncpa [#allocation6], 1 }
 0x209   :  { %253 = vsyncpa [#allocation4], 1 }
 0x20a   :  { %254 = vsyncpa [#allocation10], 1 }

</bundles_post_ra>
